<compile_context>
chip_gen: v7x
topology: tpu7x:2x2x1
jax: 0.10.0
libtpu: 0.0.40
codegen_flags: <defaults>
</compile_context>

<pallas_src>
import jax
import jax.numpy as jnp
from jax.experimental import pallas as pl
from jax.experimental.pallas import tpu as pltpu


def _make_kernel(N, h, WL):
    NH = N * h

    def kernel(a_ref, x_ref, g_ref, b_ref, o_ref):
        # a_ref: (1, N, N*h, WL) f32  adjacency expanded over lanes (j,head,c)
        #                             and sublanes (image row i)
        # x_ref: (1, N*h, WL)   bf16  rows=(n,i), lanes=(j,head,c)
        # g_ref: (3*WL, WL)     bf16  K-stacked folded depthwise-cols + pointwise
        # b_ref: (1, WL)        f32   folded bias
        # o_ref: (1, N*h, WL)   bf16
        xv = x_ref[0].astype(jnp.float32)                      # (NH, WL)

        # ---- node mixing: mixed[n*h+i] = sum_m A[n,m,head] * x[m*h+i]  (VPU) ----
        rows = []
        for n in range(N):
            acc = a_ref[0, n, 0:h, :] * xv[0:h, :]
            for m in range(1, N):
                acc = acc + (a_ref[0, n, m * h:(m + 1) * h, :]
                             * xv[m * h:(m + 1) * h, :])
            rows.append(acc)
        mixed = jnp.concatenate(rows, axis=0)                   # (NH, WL) f32

        # ---- vertical taps via sublane roll + node-boundary masks (XLU/VPU) ----
        ii = jax.lax.broadcasted_iota(jnp.int32, (N, h, WL), 1).reshape(NH, WL)
        up = pltpu.roll(mixed, shift=1, axis=0)        # row r <- mixed[r-1]
        dn = pltpu.roll(mixed, shift=NH - 1, axis=0)   # row r <- mixed[r+1]
        tap_top = jnp.where(ii == 0, 0.0, up)          # zero pad at image row 0
        tap_bot = jnp.where(ii == h - 1, 0.0, dn)      # zero pad at image row h-1

        # ---- SepConv: one bf16 MXU matmul (K = 3*WL), f32 accumulation ----
        rows_cat = jnp.concatenate(
            [tap_top.astype(jnp.bfloat16),
             mixed.astype(jnp.bfloat16),
             tap_bot.astype(jnp.bfloat16)], axis=-1)            # (NH, 3*WL)
        y = jnp.dot(rows_cat, g_ref[...], preferred_element_type=jnp.float32)
        y = y + b_ref[0, :]
        o_ref[0] = y.astype(o_ref.dtype)

    return kernel


def fold_sepconv_weights(wdw, bdw, wpw, bpw, w):
    """Fold depthwise-3x3 column taps + pointwise 1x1 into (3*WL, WL) bf16 + bias.

    Hoisted out of the per-call path: call once per weight update, not per step.
    """
    dim = wpw.shape[0]
    WL = w * dim
    f32 = jnp.float32
    w_pw = jnp.kron(jnp.eye(w, dtype=f32), wpw.astype(f32))          # (WL, WL)
    g_list = []
    for ti in range(3):                                              # vertical tap
        m_ti = jnp.zeros((WL, WL), f32)
        for tj in range(3):                                          # horizontal tap
            m_ti = m_ti + jnp.kron(jnp.eye(w, k=1 - tj, dtype=f32),
                                   jnp.diag(wdw[ti, tj, :].astype(f32)))
        g_list.append(m_ti @ w_pw)
    g_cat = jnp.concatenate(g_list, axis=0).astype(jnp.bfloat16)     # (3*WL, WL)
    bias = (jnp.tile(bdw.astype(f32), w)[None, :] @ w_pw
            + jnp.tile(bpw.astype(f32), w)[None, :])                 # (1, WL) f32
    return g_cat, bias


@jax.jit
def conv_iter(x, A, g_cat, bias):
    """x: (B,H,N,C,h,w)  A: (B,H,N,N)  g_cat: (3*WL, WL) bf16  bias: (1, WL) f32."""
    B, H, N, C, h, w = x.shape
    dim = H * C
    WL = w * dim

    # activations 'b h n c i j -> b (n i) (j h c)'  (cast to bf16 BEFORE the transpose)
    xz = (x.astype(jnp.bfloat16)
           .transpose(0, 2, 4, 5, 1, 3)            # (B, N, h, w, H, C)
           .reshape(B, N * h, WL))

    # adjacency expanded over lanes (j, head, c) AND sublanes (image row i):
    #   a_full[b, n, m*h + i, j*dim + head*C + c] = A[b, head, n, m]
    a_lane = jnp.tile(
        jnp.repeat(A.transpose(0, 2, 3, 1).astype(jnp.float32), C, axis=-1),
        (1, 1, 1, w))                                                  # (B, N, N, WL)
    a_full = jnp.broadcast_to(a_lane[:, :, :, None, :],
                              (B, N, N, h, WL)).reshape(B, N, N * h, WL)

    kernel = _make_kernel(N, h, WL)
    out = pl.pallas_call(
        kernel,
        out_shape=jax.ShapeDtypeStruct((B, N * h, WL), jnp.bfloat16),
        grid=(B,),
        in_specs=[
            pl.BlockSpec((1, N, N * h, WL), lambda b: (b, 0, 0, 0)),
            pl.BlockSpec((1, N * h, WL), lambda b: (b, 0, 0)),
            pl.BlockSpec((3 * WL, WL), lambda b: (0, 0)),
            pl.BlockSpec((1, WL), lambda b: (0, 0)),
        ],
        out_specs=pl.BlockSpec((1, N * h, WL), lambda b: (b, 0, 0)),
        compiler_params=pltpu.CompilerParams(
            dimension_semantics=("parallel",)),
    )(a_full, xz, g_cat, bias)

    # '(n i)(j h c)' back to 'b h n c i j' -- transpose in bf16, upcast last.
    out = (out.reshape(B, N, h, w, H, C)
              .transpose(0, 4, 1, 5, 2, 3)
              .astype(jnp.float32))
    return out


# ------------------------ pure-JAX reference (NCHW) ------------------------
def reference(x, A, wdw, bdw, wpw, bpw):
    y = jnp.einsum('bhnm,bhmcij->bhncij', A, x)
    B, H, N, C, h, w = y.shape
    dim = H * C
    z = y.transpose(0, 2, 1, 3, 4, 5).reshape(B * N, dim, h, w)
    # depthwise (groups=dim): OIHW weight (dim, 1, 3, 3)
    dw_w = wdw.transpose(2, 0, 1)[:, None, :, :]
    z1 = jax.lax.conv_general_dilated(
        z, dw_w, (1, 1), [(1, 1), (1, 1)],
        feature_group_count=dim, dimension_numbers=('NCHW', 'OIHW', 'NCHW'))
    z1 = z1 + bdw[None, :, None, None]
    # pointwise 1x1: OIHW weight (out, in, 1, 1); wpw is (in, out)
    pw_w = wpw.T[:, :, None, None]
    z2 = jax.lax.conv_general_dilated(
        z1, pw_w, (1, 1), [(0, 0), (0, 0)],
        dimension_numbers=('NCHW', 'OIHW', 'NCHW'))
    z2 = z2 + bpw[None, :, None, None]
    return z2.reshape(B, N, H, C, h, w).transpose(0, 2, 1, 3, 4, 5)


if __name__ == "__main__":
    # dim=32, num_head=4 -> C=8, B=2, N = T*N_obj + 1 = 5, spatial h=w=8.
    B, H, N, C, h, w = 2, 4, 5, 8, 8, 8
    dim = H * C

    key = jax.random.PRNGKey(0)
    kx, ka, k1, k2, k3, k4 = jax.random.split(key, 6)

    x = jax.random.normal(kx, (B, H, N, C, h, w), jnp.float32)
    A = jax.random.normal(ka, (B, H, N, N), jnp.float32) / N

    # SepConv parameters: depthwise 3x3 (HWC) + pointwise 1x1 (in, out), with biases.
    wdw = jax.random.normal(k1, (3, 3, dim), jnp.float32) * 0.1
    bdw = jax.random.normal(k2, (dim,), jnp.float32) * 0.1
    wpw = jax.random.normal(k3, (dim, dim), jnp.float32) * 0.1
    bpw = jax.random.normal(k4, (dim,), jnp.float32) * 0.1

    # Weight folding hoisted out of the per-call path (once per weight update).
    g_cat, bias = fold_sepconv_weights(wdw, bdw, wpw, bpw, w)

    out = jax.block_until_ready(conv_iter(x, A, g_cat, bias))
    ref = jax.block_until_ready(reference(x, A, wdw, bdw, wpw, bpw))

    assert out.shape == (B, H, N, C, h, w), out.shape
    err = float(jnp.max(jnp.abs(out - ref)))
    assert jnp.allclose(out, ref, rtol=2e-2, atol=2e-2), err
    print("KERNEL_OK")
</pallas_src>

<mosaic_0001>
module attributes {stable_mosaic.version = 11 : i64} {
  func.func @kernel(%arg0: i32, %arg1: memref<1x5x40x256xf32, #tpu.memory_space<vmem>>, %arg2: memref<1x40x256xbf16, #tpu.memory_space<vmem>>, %arg3: memref<768x256xbf16, #tpu.memory_space<vmem>>, %arg4: memref<1x256xf32, #tpu.memory_space<vmem>>, %arg5: memref<1x40x256xbf16, #tpu.memory_space<vmem>>) attributes {dimension_semantics = [#tpu.dimension_semantics<parallel>], iteration_bounds = array<i64: 2>, scalar_prefetch = 0 : i64, scratch_operands = 0 : i64, tpu.core_type = #tpu.core_type<tc>, window_params = [{transform_indices = @transform_0, window_bounds = array<i64: 1, 5, 40, 256>}, {transform_indices = @transform_1, window_bounds = array<i64: 1, 40, 256>}, {pipeline_mode = #tpu.pipeline_mode<synchronous>, transform_indices = @transform_2, window_bounds = array<i64: 768, 256>}, {pipeline_mode = #tpu.pipeline_mode<synchronous>, transform_indices = @transform_3, window_bounds = array<i64: 1, 256>}, {transform_indices = @transform_4, window_bounds = array<i64: 1, 40, 256>}]} {
    %c0 = arith.constant 0 : index
    %c0_0 = arith.constant 0 : index
    %c0_1 = arith.constant 0 : index
    %0 = vector.load %arg2[%c0, %c0_0, %c0_1] : memref<1x40x256xbf16, #tpu.memory_space<vmem>>, vector<1x40x256xbf16>
    %1 = vector.shape_cast %0 : vector<1x40x256xbf16> to vector<40x256xbf16>
    %2 = arith.extf %1 : vector<40x256xbf16> to vector<40x256xf32>
    %c0_2 = arith.constant 0 : index
    %c0_3 = arith.constant 0 : index
    %c0_4 = arith.constant 0 : index
    %c0_5 = arith.constant 0 : index
    %3 = vector.load %arg1[%c0_2, %c0_3, %c0_4, %c0_5] : memref<1x5x40x256xf32, #tpu.memory_space<vmem>>, vector<1x1x8x256xf32>
    %4 = vector.shape_cast %3 : vector<1x1x8x256xf32> to vector<8x256xf32>
    %5 = vector.extract_strided_slice %2 {offsets = [0, 0], sizes = [8, 256], strides = [1, 1]} : vector<40x256xf32> to vector<8x256xf32>
    %6 = arith.mulf %4, %5 : vector<8x256xf32>
    %c0_6 = arith.constant 0 : index
    %c0_7 = arith.constant 0 : index
    %c8 = arith.constant 8 : index
    %c0_8 = arith.constant 0 : index
    %7 = vector.load %arg1[%c0_6, %c0_7, %c8, %c0_8] : memref<1x5x40x256xf32, #tpu.memory_space<vmem>>, vector<1x1x8x256xf32>
    %8 = vector.shape_cast %7 : vector<1x1x8x256xf32> to vector<8x256xf32>
    %9 = vector.extract_strided_slice %2 {offsets = [8, 0], sizes = [8, 256], strides = [1, 1]} : vector<40x256xf32> to vector<8x256xf32>
    %10 = arith.mulf %8, %9 : vector<8x256xf32>
    %11 = arith.addf %6, %10 : vector<8x256xf32>
    %c0_9 = arith.constant 0 : index
    %c0_10 = arith.constant 0 : index
    %c16 = arith.constant 16 : index
    %c0_11 = arith.constant 0 : index
    %12 = vector.load %arg1[%c0_9, %c0_10, %c16, %c0_11] : memref<1x5x40x256xf32, #tpu.memory_space<vmem>>, vector<1x1x8x256xf32>
    %13 = vector.shape_cast %12 : vector<1x1x8x256xf32> to vector<8x256xf32>
    %14 = vector.extract_strided_slice %2 {offsets = [16, 0], sizes = [8, 256], strides = [1, 1]} : vector<40x256xf32> to vector<8x256xf32>
    %15 = arith.mulf %13, %14 : vector<8x256xf32>
    %16 = arith.addf %11, %15 : vector<8x256xf32>
    %c0_12 = arith.constant 0 : index
    %c0_13 = arith.constant 0 : index
    %c24 = arith.constant 24 : index
    %c0_14 = arith.constant 0 : index
    %17 = vector.load %arg1[%c0_12, %c0_13, %c24, %c0_14] : memref<1x5x40x256xf32, #tpu.memory_space<vmem>>, vector<1x1x8x256xf32>
    %18 = vector.shape_cast %17 : vector<1x1x8x256xf32> to vector<8x256xf32>
    %19 = vector.extract_strided_slice %2 {offsets = [24, 0], sizes = [8, 256], strides = [1, 1]} : vector<40x256xf32> to vector<8x256xf32>
    %20 = arith.mulf %18, %19 : vector<8x256xf32>
    %21 = arith.addf %16, %20 : vector<8x256xf32>
    %c0_15 = arith.constant 0 : index
    %c0_16 = arith.constant 0 : index
    %c32 = arith.constant 32 : index
    %c0_17 = arith.constant 0 : index
    %22 = vector.load %arg1[%c0_15, %c0_16, %c32, %c0_17] : memref<1x5x40x256xf32, #tpu.memory_space<vmem>>, vector<1x1x8x256xf32>
    %23 = vector.shape_cast %22 : vector<1x1x8x256xf32> to vector<8x256xf32>
    %24 = vector.extract_strided_slice %2 {offsets = [32, 0], sizes = [8, 256], strides = [1, 1]} : vector<40x256xf32> to vector<8x256xf32>
    %25 = arith.mulf %23, %24 : vector<8x256xf32>
    %26 = arith.addf %21, %25 : vector<8x256xf32>
    %c0_18 = arith.constant 0 : index
    %c1 = arith.constant 1 : index
    %c0_19 = arith.constant 0 : index
    %c0_20 = arith.constant 0 : index
    %27 = vector.load %arg1[%c0_18, %c1, %c0_19, %c0_20] : memref<1x5x40x256xf32, #tpu.memory_space<vmem>>, vector<1x1x8x256xf32>
    %28 = vector.shape_cast %27 : vector<1x1x8x256xf32> to vector<8x256xf32>
    %29 = vector.extract_strided_slice %2 {offsets = [0, 0], sizes = [8, 256], strides = [1, 1]} : vector<40x256xf32> to vector<8x256xf32>
    %30 = arith.mulf %28, %29 : vector<8x256xf32>
    %c0_21 = arith.constant 0 : index
    %c1_22 = arith.constant 1 : index
    %c8_23 = arith.constant 8 : index
    %c0_24 = arith.constant 0 : index
    %31 = vector.load %arg1[%c0_21, %c1_22, %c8_23, %c0_24] : memref<1x5x40x256xf32, #tpu.memory_space<vmem>>, vector<1x1x8x256xf32>
    %32 = vector.shape_cast %31 : vector<1x1x8x256xf32> to vector<8x256xf32>
    %33 = vector.extract_strided_slice %2 {offsets = [8, 0], sizes = [8, 256], strides = [1, 1]} : vector<40x256xf32> to vector<8x256xf32>
    %34 = arith.mulf %32, %33 : vector<8x256xf32>
    %35 = arith.addf %30, %34 : vector<8x256xf32>
    %c0_25 = arith.constant 0 : index
    %c1_26 = arith.constant 1 : index
    %c16_27 = arith.constant 16 : index
    %c0_28 = arith.constant 0 : index
    %36 = vector.load %arg1[%c0_25, %c1_26, %c16_27, %c0_28] : memref<1x5x40x256xf32, #tpu.memory_space<vmem>>, vector<1x1x8x256xf32>
    %37 = vector.shape_cast %36 : vector<1x1x8x256xf32> to vector<8x256xf32>
    %38 = vector.extract_strided_slice %2 {offsets = [16, 0], sizes = [8, 256], strides = [1, 1]} : vector<40x256xf32> to vector<8x256xf32>
    %39 = arith.mulf %37, %38 : vector<8x256xf32>
    %40 = arith.addf %35, %39 : vector<8x256xf32>
    %c0_29 = arith.constant 0 : index
    %c1_30 = arith.constant 1 : index
    %c24_31 = arith.constant 24 : index
    %c0_32 = arith.constant 0 : index
    %41 = vector.load %arg1[%c0_29, %c1_30, %c24_31, %c0_32] : memref<1x5x40x256xf32, #tpu.memory_space<vmem>>, vector<1x1x8x256xf32>
    %42 = vector.shape_cast %41 : vector<1x1x8x256xf32> to vector<8x256xf32>
    %43 = vector.extract_strided_slice %2 {offsets = [24, 0], sizes = [8, 256], strides = [1, 1]} : vector<40x256xf32> to vector<8x256xf32>
    %44 = arith.mulf %42, %43 : vector<8x256xf32>
    %45 = arith.addf %40, %44 : vector<8x256xf32>
    %c0_33 = arith.constant 0 : index
    %c1_34 = arith.constant 1 : index
    %c32_35 = arith.constant 32 : index
    %c0_36 = arith.constant 0 : index
    %46 = vector.load %arg1[%c0_33, %c1_34, %c32_35, %c0_36] : memref<1x5x40x256xf32, #tpu.memory_space<vmem>>, vector<1x1x8x256xf32>
    %47 = vector.shape_cast %46 : vector<1x1x8x256xf32> to vector<8x256xf32>
    %48 = vector.extract_strided_slice %2 {offsets = [32, 0], sizes = [8, 256], strides = [1, 1]} : vector<40x256xf32> to vector<8x256xf32>
    %49 = arith.mulf %47, %48 : vector<8x256xf32>
    %50 = arith.addf %45, %49 : vector<8x256xf32>
    %c0_37 = arith.constant 0 : index
    %c2 = arith.constant 2 : index
    %c0_38 = arith.constant 0 : index
    %c0_39 = arith.constant 0 : index
    %51 = vector.load %arg1[%c0_37, %c2, %c0_38, %c0_39] : memref<1x5x40x256xf32, #tpu.memory_space<vmem>>, vector<1x1x8x256xf32>
    %52 = vector.shape_cast %51 : vector<1x1x8x256xf32> to vector<8x256xf32>
    %53 = vector.extract_strided_slice %2 {offsets = [0, 0], sizes = [8, 256], strides = [1, 1]} : vector<40x256xf32> to vector<8x256xf32>
    %54 = arith.mulf %52, %53 : vector<8x256xf32>
    %c0_40 = arith.constant 0 : index
    %c2_41 = arith.constant 2 : index
    %c8_42 = arith.constant 8 : index
    %c0_43 = arith.constant 0 : index
    %55 = vector.load %arg1[%c0_40, %c2_41, %c8_42, %c0_43] : memref<1x5x40x256xf32, #tpu.memory_space<vmem>>, vector<1x1x8x256xf32>
    %56 = vector.shape_cast %55 : vector<1x1x8x256xf32> to vector<8x256xf32>
    %57 = vector.extract_strided_slice %2 {offsets = [8, 0], sizes = [8, 256], strides = [1, 1]} : vector<40x256xf32> to vector<8x256xf32>
    %58 = arith.mulf %56, %57 : vector<8x256xf32>
    %59 = arith.addf %54, %58 : vector<8x256xf32>
    %c0_44 = arith.constant 0 : index
    %c2_45 = arith.constant 2 : index
    %c16_46 = arith.constant 16 : index
    %c0_47 = arith.constant 0 : index
    %60 = vector.load %arg1[%c0_44, %c2_45, %c16_46, %c0_47] : memref<1x5x40x256xf32, #tpu.memory_space<vmem>>, vector<1x1x8x256xf32>
    %61 = vector.shape_cast %60 : vector<1x1x8x256xf32> to vector<8x256xf32>
    %62 = vector.extract_strided_slice %2 {offsets = [16, 0], sizes = [8, 256], strides = [1, 1]} : vector<40x256xf32> to vector<8x256xf32>
    %63 = arith.mulf %61, %62 : vector<8x256xf32>
    %64 = arith.addf %59, %63 : vector<8x256xf32>
    %c0_48 = arith.constant 0 : index
    %c2_49 = arith.constant 2 : index
    %c24_50 = arith.constant 24 : index
    %c0_51 = arith.constant 0 : index
    %65 = vector.load %arg1[%c0_48, %c2_49, %c24_50, %c0_51] : memref<1x5x40x256xf32, #tpu.memory_space<vmem>>, vector<1x1x8x256xf32>
    %66 = vector.shape_cast %65 : vector<1x1x8x256xf32> to vector<8x256xf32>
    %67 = vector.extract_strided_slice %2 {offsets = [24, 0], sizes = [8, 256], strides = [1, 1]} : vector<40x256xf32> to vector<8x256xf32>
    %68 = arith.mulf %66, %67 : vector<8x256xf32>
    %69 = arith.addf %64, %68 : vector<8x256xf32>
    %c0_52 = arith.constant 0 : index
    %c2_53 = arith.constant 2 : index
    %c32_54 = arith.constant 32 : index
    %c0_55 = arith.constant 0 : index
    %70 = vector.load %arg1[%c0_52, %c2_53, %c32_54, %c0_55] : memref<1x5x40x256xf32, #tpu.memory_space<vmem>>, vector<1x1x8x256xf32>
    %71 = vector.shape_cast %70 : vector<1x1x8x256xf32> to vector<8x256xf32>
    %72 = vector.extract_strided_slice %2 {offsets = [32, 0], sizes = [8, 256], strides = [1, 1]} : vector<40x256xf32> to vector<8x256xf32>
    %73 = arith.mulf %71, %72 : vector<8x256xf32>
    %74 = arith.addf %69, %73 : vector<8x256xf32>
    %c0_56 = arith.constant 0 : index
    %c3 = arith.constant 3 : index
    %c0_57 = arith.constant 0 : index
    %c0_58 = arith.constant 0 : index
    %75 = vector.load %arg1[%c0_56, %c3, %c0_57, %c0_58] : memref<1x5x40x256xf32, #tpu.memory_space<vmem>>, vector<1x1x8x256xf32>
    %76 = vector.shape_cast %75 : vector<1x1x8x256xf32> to vector<8x256xf32>
    %77 = vector.extract_strided_slice %2 {offsets = [0, 0], sizes = [8, 256], strides = [1, 1]} : vector<40x256xf32> to vector<8x256xf32>
    %78 = arith.mulf %76, %77 : vector<8x256xf32>
    %c0_59 = arith.constant 0 : index
    %c3_60 = arith.constant 3 : index
    %c8_61 = arith.constant 8 : index
    %c0_62 = arith.constant 0 : index
    %79 = vector.load %arg1[%c0_59, %c3_60, %c8_61, %c0_62] : memref<1x5x40x256xf32, #tpu.memory_space<vmem>>, vector<1x1x8x256xf32>
    %80 = vector.shape_cast %79 : vector<1x1x8x256xf32> to vector<8x256xf32>
    %81 = vector.extract_strided_slice %2 {offsets = [8, 0], sizes = [8, 256], strides = [1, 1]} : vector<40x256xf32> to vector<8x256xf32>
    %82 = arith.mulf %80, %81 : vector<8x256xf32>
    %83 = arith.addf %78, %82 : vector<8x256xf32>
    %c0_63 = arith.constant 0 : index
    %c3_64 = arith.constant 3 : index
    %c16_65 = arith.constant 16 : index
    %c0_66 = arith.constant 0 : index
    %84 = vector.load %arg1[%c0_63, %c3_64, %c16_65, %c0_66] : memref<1x5x40x256xf32, #tpu.memory_space<vmem>>, vector<1x1x8x256xf32>
    %85 = vector.shape_cast %84 : vector<1x1x8x256xf32> to vector<8x256xf32>
    %86 = vector.extract_strided_slice %2 {offsets = [16, 0], sizes = [8, 256], strides = [1, 1]} : vector<40x256xf32> to vector<8x256xf32>
    %87 = arith.mulf %85, %86 : vector<8x256xf32>
    %88 = arith.addf %83, %87 : vector<8x256xf32>
    %c0_67 = arith.constant 0 : index
    %c3_68 = arith.constant 3 : index
    %c24_69 = arith.constant 24 : index
    %c0_70 = arith.constant 0 : index
    %89 = vector.load %arg1[%c0_67, %c3_68, %c24_69, %c0_70] : memref<1x5x40x256xf32, #tpu.memory_space<vmem>>, vector<1x1x8x256xf32>
    %90 = vector.shape_cast %89 : vector<1x1x8x256xf32> to vector<8x256xf32>
    %91 = vector.extract_strided_slice %2 {offsets = [24, 0], sizes = [8, 256], strides = [1, 1]} : vector<40x256xf32> to vector<8x256xf32>
    %92 = arith.mulf %90, %91 : vector<8x256xf32>
    %93 = arith.addf %88, %92 : vector<8x256xf32>
    %c0_71 = arith.constant 0 : index
    %c3_72 = arith.constant 3 : index
    %c32_73 = arith.constant 32 : index
    %c0_74 = arith.constant 0 : index
    %94 = vector.load %arg1[%c0_71, %c3_72, %c32_73, %c0_74] : memref<1x5x40x256xf32, #tpu.memory_space<vmem>>, vector<1x1x8x256xf32>
    %95 = vector.shape_cast %94 : vector<1x1x8x256xf32> to vector<8x256xf32>
    %96 = vector.extract_strided_slice %2 {offsets = [32, 0], sizes = [8, 256], strides = [1, 1]} : vector<40x256xf32> to vector<8x256xf32>
    %97 = arith.mulf %95, %96 : vector<8x256xf32>
    %98 = arith.addf %93, %97 : vector<8x256xf32>
    %c0_75 = arith.constant 0 : index
    %c4 = arith.constant 4 : index
    %c0_76 = arith.constant 0 : index
    %c0_77 = arith.constant 0 : index
    %99 = vector.load %arg1[%c0_75, %c4, %c0_76, %c0_77] : memref<1x5x40x256xf32, #tpu.memory_space<vmem>>, vector<1x1x8x256xf32>
    %100 = vector.shape_cast %99 : vector<1x1x8x256xf32> to vector<8x256xf32>
    %101 = vector.extract_strided_slice %2 {offsets = [0, 0], sizes = [8, 256], strides = [1, 1]} : vector<40x256xf32> to vector<8x256xf32>
    %102 = arith.mulf %100, %101 : vector<8x256xf32>
    %c0_78 = arith.constant 0 : index
    %c4_79 = arith.constant 4 : index
    %c8_80 = arith.constant 8 : index
    %c0_81 = arith.constant 0 : index
    %103 = vector.load %arg1[%c0_78, %c4_79, %c8_80, %c0_81] : memref<1x5x40x256xf32, #tpu.memory_space<vmem>>, vector<1x1x8x256xf32>
    %104 = vector.shape_cast %103 : vector<1x1x8x256xf32> to vector<8x256xf32>
    %105 = vector.extract_strided_slice %2 {offsets = [8, 0], sizes = [8, 256], strides = [1, 1]} : vector<40x256xf32> to vector<8x256xf32>
    %106 = arith.mulf %104, %105 : vector<8x256xf32>
    %107 = arith.addf %102, %106 : vector<8x256xf32>
    %c0_82 = arith.constant 0 : index
    %c4_83 = arith.constant 4 : index
    %c16_84 = arith.constant 16 : index
    %c0_85 = arith.constant 0 : index
    %108 = vector.load %arg1[%c0_82, %c4_83, %c16_84, %c0_85] : memref<1x5x40x256xf32, #tpu.memory_space<vmem>>, vector<1x1x8x256xf32>
    %109 = vector.shape_cast %108 : vector<1x1x8x256xf32> to vector<8x256xf32>
    %110 = vector.extract_strided_slice %2 {offsets = [16, 0], sizes = [8, 256], strides = [1, 1]} : vector<40x256xf32> to vector<8x256xf32>
    %111 = arith.mulf %109, %110 : vector<8x256xf32>
    %112 = arith.addf %107, %111 : vector<8x256xf32>
    %c0_86 = arith.constant 0 : index
    %c4_87 = arith.constant 4 : index
    %c24_88 = arith.constant 24 : index
    %c0_89 = arith.constant 0 : index
    %113 = vector.load %arg1[%c0_86, %c4_87, %c24_88, %c0_89] : memref<1x5x40x256xf32, #tpu.memory_space<vmem>>, vector<1x1x8x256xf32>
    %114 = vector.shape_cast %113 : vector<1x1x8x256xf32> to vector<8x256xf32>
    %115 = vector.extract_strided_slice %2 {offsets = [24, 0], sizes = [8, 256], strides = [1, 1]} : vector<40x256xf32> to vector<8x256xf32>
    %116 = arith.mulf %114, %115 : vector<8x256xf32>
    %117 = arith.addf %112, %116 : vector<8x256xf32>
    %c0_90 = arith.constant 0 : index
    %c4_91 = arith.constant 4 : index
    %c32_92 = arith.constant 32 : index
    %c0_93 = arith.constant 0 : index
    %118 = vector.load %arg1[%c0_90, %c4_91, %c32_92, %c0_93] : memref<1x5x40x256xf32, #tpu.memory_space<vmem>>, vector<1x1x8x256xf32>
    %119 = vector.shape_cast %118 : vector<1x1x8x256xf32> to vector<8x256xf32>
    %120 = vector.extract_strided_slice %2 {offsets = [32, 0], sizes = [8, 256], strides = [1, 1]} : vector<40x256xf32> to vector<8x256xf32>
    %121 = arith.mulf %119, %120 : vector<8x256xf32>
    %122 = arith.addf %117, %121 : vector<8x256xf32>
    %123 = tpu.concatenate %26, %50, %74, %98, %122 in 0 : vector<8x256xf32>, vector<8x256xf32>, vector<8x256xf32>, vector<8x256xf32>, vector<8x256xf32> -> vector<40x256xf32>
    %124 = tpu.iota {dimensions = array<i32: 1>} : vector<5x8x256xi32>
    %125 = vector.shape_cast %124 : vector<5x8x256xi32> to vector<40x256xi32>
    %c1_i32 = arith.constant 1 : i32
    %126 = tpu.dynamic_rotate %123 by %c1_i32 dim 0 : vector<40x256xf32>, i32 -> vector<40x256xf32>
    %c39_i32 = arith.constant 39 : i32
    %127 = tpu.dynamic_rotate %123 by %c39_i32 dim 0 : vector<40x256xf32>, i32 -> vector<40x256xf32>
    %c0_i32 = arith.constant 0 : i32
    %128 = vector.broadcast %c0_i32 : i32 to vector<40x256xi32>
    %129 = arith.cmpi eq, %125, %128 : vector<40x256xi32>
    %cst = arith.constant 0.000000e+00 : f32
    %130 = vector.broadcast %cst : f32 to vector<40x256xf32>
    %131 = arith.select %129, %130, %126 : vector<40x256xi1>, vector<40x256xf32>
    %c7_i32 = arith.constant 7 : i32
    %132 = vector.broadcast %c7_i32 : i32 to vector<40x256xi32>
    %133 = arith.cmpi eq, %125, %132 : vector<40x256xi32>
    %cst_94 = arith.constant 0.000000e+00 : f32
    %134 = vector.broadcast %cst_94 : f32 to vector<40x256xf32>
    %135 = arith.select %133, %134, %127 : vector<40x256xi1>, vector<40x256xf32>
    %136 = arith.truncf %131 : vector<40x256xf32> to vector<40x256xbf16>
    %137 = arith.truncf %123 : vector<40x256xf32> to vector<40x256xbf16>
    %138 = arith.truncf %135 : vector<40x256xf32> to vector<40x256xbf16>
    %139 = tpu.concatenate %136, %137, %138 in 1 : vector<40x256xbf16>, vector<40x256xbf16>, vector<40x256xbf16> -> vector<40x768xbf16>
    %c0_95 = arith.constant 0 : index
    %c0_96 = arith.constant 0 : index
    %140 = vector.load %arg3[%c0_95, %c0_96] : memref<768x256xbf16, #tpu.memory_space<vmem>>, vector<768x256xbf16>
    %cst_97 = arith.constant dense<0.000000e+00> : vector<40x256xf32>
    %141 = tpu.matmul %139, %140, %cst_97 {dimension_numbers = #tpu.dot_dimension_numbers<[1], [0], [0], [1], [0, 0, 1, 1], [], []>} : vector<40x768xbf16>, vector<768x256xbf16>, vector<40x256xf32> -> vector<40x256xf32>
    %c0_98 = arith.constant 0 : index
    %c0_99 = arith.constant 0 : index
    %142 = vector.load %arg4[%c0_98, %c0_99] : memref<1x256xf32, #tpu.memory_space<vmem>>, vector<1x256xf32>
    %143 = vector.shape_cast %142 : vector<1x256xf32> to vector<256xf32>
    %144 = vector.shape_cast %143 : vector<256xf32> to vector<1x256xf32>
    %145 = vector.broadcast %144 : vector<1x256xf32> to vector<40x256xf32>
    %146 = arith.addf %141, %145 : vector<40x256xf32>
    %147 = arith.truncf %146 : vector<40x256xf32> to vector<40x256xbf16>
    %c0_100 = arith.constant 0 : index
    %c0_101 = arith.constant 0 : index
    %c0_102 = arith.constant 0 : index
    %148 = vector.load %arg5[%c0_100, %c0_101, %c0_102] : memref<1x40x256xbf16, #tpu.memory_space<vmem>>, vector<1x40x256xbf16>
    %149 = vector.shape_cast %148 : vector<1x40x256xbf16> to vector<40x256xbf16>
    %150 = vector.shape_cast %147 : vector<40x256xbf16> to vector<1x40x256xbf16>
    tpu.vector_store %arg5[%c0_100, %c0_101, %c0_102], %150 {strides = array<i32>} : memref<1x40x256xbf16, #tpu.memory_space<vmem>>, vector<1x40x256xbf16>,
    return
  }
  func.func @transform_0(%arg0: i32) -> (i32, i32, i32, i32) {
    %c0_i32 = arith.constant 0 : i32
    %c0_i32_0 = arith.constant 0 : i32
    %c0_i32_1 = arith.constant 0 : i32
    %c0_i32_2 = arith.constant 0 : i32
    return %arg0, %c0_i32, %c0_i32_0, %c0_i32_1 : i32, i32, i32, i32
  }
  func.func @transform_1(%arg0: i32) -> (i32, i32, i32) {
    %c0_i32 = arith.constant 0 : i32
    %c0_i32_0 = arith.constant 0 : i32
    %c0_i32_1 = arith.constant 0 : i32
    return %arg0, %c0_i32, %c0_i32_0 : i32, i32, i32
  }
  func.func @transform_2(%arg0: i32) -> (i32, i32) {
    %c0_i32 = arith.constant 0 : i32
    %c0_i32_0 = arith.constant 0 : i32
    %c0_i32_1 = arith.constant 0 : i32
    return %c0_i32, %c0_i32_0 : i32, i32
  }
  func.func @transform_3(%arg0: i32) -> (i32, i32) {
    %c0_i32 = arith.constant 0 : i32
    %c0_i32_0 = arith.constant 0 : i32
    %c0_i32_1 = arith.constant 0 : i32
    return %c0_i32, %c0_i32_0 : i32, i32
  }
  func.func @transform_4(%arg0: i32) -> (i32, i32, i32) {
    %c0_i32 = arith.constant 0 : i32
    %c0_i32_0 = arith.constant 0 : i32
    %c0_i32_1 = arith.constant 0 : i32
    return %arg0, %c0_i32, %c0_i32_0 : i32, i32, i32
  }
}

</mosaic_0001>

<bundles_post_ra>
// kernel: conv_iter.1
= control target key start
LH: loop header
LB: loop body
LE: loop exit
PB: predicated region body
PF: predicated region fallthrough
CT: control target
= control target key end

     0   :  { %s1803_s15 = smov 0   ;;  %s2411_s0 = inlined_call_operand.vmem [shape: f32[2,5,40,256], index: 0, kind: input, shape index: {}]   ;;  %s2412_s1 = inlined_call_operand.vmem [shape: bf16[2,40,256], index: 1, kind: input, shape index: {}]   ;;  %s2413_s2 = inlined_call_operand.vmem [shape: bf16[768,256], index: 2, kind: input, shape index: {}]   ;;  %s2414_s3 = inlined_call_operand.vmem [shape: f32[1,256], index: 3, kind: input, shape index: {}]   ;;  %s2415_s4 = inlined_call_operand.vmem [shape: bf16[2,40,256], index: 4, kind: output, shape index: {}]  }
   0x1 LB: > { %s1336_s16 = sadd.s32 4294967295, %s1776_s15   ;;  %p1340_p0 = scmp.ge.s32.totalorder %s1776_s15, 1  ;;  %s1776_s15 = sphi %s1803_s15, %s14_s15  }
   0x2   : > { %p172_p1 = scmp.lt.s32.totalorder %s1776_s15, 3 }
   0x4   : > { %p173_p2 = pnand %p1340_p0, %p172_p1 }
   0x5   : > { %v1626_v0 = vld [vmem:[%s2413_s2 + $0x4] ss:$8 sps:$4 sm:$0xff] (!%p173_p2)   ;;  %v1630_v2 = vld [vmem:[%s2413_s2] ss:$8 sps:$4 sm:$0xff] (!%p173_p2)   ;;  %v1632_v4 = vld [vmem:[%s2413_s2 + $0x14] ss:$8 sps:$4 sm:$0xff] (!%p173_p2)   ;;  %v377_v46 = vlaneseq (!%p173_p2) }
   0x6   : > { %176 = sbr.rel (%p173_p2) target bundleno = 364 (0x16c), region = 36  ;;  %v1628_v1 = vld [vmem:[%s2413_s2 + $0x104] ss:$8 sps:$4 sm:$0xff] (!%p173_p2)   ;;  %1049 = vmatprep.subr.bf16.mxu1 (!%p173_p2), %v1626_v0  ;;  %v1631_v3 = vld [vmem:[%s2413_s2 + $0x100] ss:$8 sps:$4 sm:$0xff] (!%p173_p2)   ;;  %p203_p3 = scmp.lt.s32.totalorder (!%p173_p2), %s1336_s16, 1 }
   0x7   : > { %1110 = vmatprep.subr.bf16.mxu0 (!%p173_p2), %v1628_v1  ;;  %1050 = vmatpush1.bf16.msra.mxu1 (!%p173_p2), %v1630_v2  ;;  %v1634_v5 = vld [vmem:[%s2413_s2 + $0x114] ss:$8 sps:$4 sm:$0xff] (!%p173_p2)   ;;  %v1636_v6 = vld [vmem:[%s2413_s2 + $0x10] ss:$8 sps:$4 sm:$0xff] (!%p173_p2)   ;;  %v1638_v8 = vld [vmem:[%s2413_s2 + $0x24] ss:$8 sps:$4 sm:$0xff] (!%p173_p2)  }
   0x8   : > { %1111 = vmatpush1.bf16.msra.mxu0 (!%p173_p2), %v1631_v3  ;;  %1051 = vmatprep.subr.bf16.mxu1 (!%p173_p2), %v1632_v4  ;;  %v1637_v7 = vld [vmem:[%s2413_s2 + $0x110] ss:$8 sps:$4 sm:$0xff] (!%p173_p2)   ;;  %v1640_v9 = vld [vmem:[%s2413_s2 + $0x124] ss:$8 sps:$4 sm:$0xff] (!%p173_p2)   ;;  %v1642_v10 = vld [vmem:[%s2413_s2 + $0x20] ss:$8 sps:$4 sm:$0xff] (!%p173_p2)  }
   0x9   : > { %1112 = vmatprep.subr.bf16.mxu0 (!%p173_p2), %v1634_v5  ;;  %v1643_v11 = vld [vmem:[%s2413_s2 + $0x120] ss:$8 sps:$4 sm:$0xff] (!%p173_p2)   ;;  %v1644_v12 = vld [vmem:[%s2413_s2 + $0x34] ss:$8 sps:$4 sm:$0xff] (!%p173_p2)   ;;  %v1648_v14 = vld [vmem:[%s2413_s2 + $0x30] ss:$8 sps:$4 sm:$0xff] (!%p173_p2)  }
   0xa   : > { %v1646_v13 = vld [vmem:[%s2413_s2 + $0x134] ss:$8 sps:$4 sm:$0xff] (!%p173_p2)   ;;  %v1649_v15 = vld [vmem:[%s2413_s2 + $0x130] ss:$8 sps:$4 sm:$0xff] (!%p173_p2)   ;;  %v1650_v16 = vld [vmem:[%s2413_s2 + $0x44] ss:$8 sps:$4 sm:$0xff] (!%p173_p2)  }
   0xb   : > { %1052 = vmatpush1.bf16.msra.mxu1 (!%p173_p2), %v1636_v6  ;;  %v1652_v17 = vld [vmem:[%s2413_s2 + $0x144] ss:$8 sps:$4 sm:$0xff] (!%p173_p2)   ;;  %v1654_v18 = vld [vmem:[%s2413_s2 + $0x40] ss:$8 sps:$4 sm:$0xff] (!%p173_p2)   ;;  %v1656_v20 = vld [vmem:[%s2413_s2 + $0x54] ss:$8 sps:$4 sm:$0xff] (!%p173_p2)  }
   0xc   : > { %1113 = vmatpush1.bf16.msra.mxu0 (!%p173_p2), %v1637_v7  ;;  %1053 = vmatprep.subr.bf16.mxu1 (!%p173_p2), %v1638_v8  ;;  %v1655_v19 = vld [vmem:[%s2413_s2 + $0x140] ss:$8 sps:$4 sm:$0xff] (!%p173_p2)   ;;  %v1658_v21 = vld [vmem:[%s2413_s2 + $0x154] ss:$8 sps:$4 sm:$0xff] (!%p173_p2)   ;;  %v1660_v22 = vld [vmem:[%s2413_s2 + $0x50] ss:$8 sps:$4 sm:$0xff] (!%p173_p2)  }
   0xd   : > { %1114 = vmatprep.subr.bf16.mxu0 %v1640_v9  ;;  %v1661_v23 = vld [vmem:[%s2413_s2 + $0x150] ss:$8 sps:$4 sm:$0xff]   ;;  %v1662_v24 = vld [vmem:[%s2413_s2 + $0x64] ss:$8 sps:$4 sm:$0xff]   ;;  %v1666_v26 = vld [vmem:[%s2413_s2 + $0x60] ss:$8 sps:$4 sm:$0xff]  }
   0xe   : > { %v1664_v25 = vld [vmem:[%s2413_s2 + $0x164] ss:$8 sps:$4 sm:$0xff]   ;;  %v1667_v27 = vld [vmem:[%s2413_s2 + $0x160] ss:$8 sps:$4 sm:$0xff]   ;;  %v1668_v28 = vld [vmem:[%s2413_s2 + $0x74] ss:$8 sps:$4 sm:$0xff]  }
   0xf   : > { %1054 = vmatpush1.bf16.msra.mxu1 %v1642_v10  ;;  %v1670_v29 = vld [vmem:[%s2413_s2 + $0x174] ss:$8 sps:$4 sm:$0xff]   ;;  %v1672_v30 = vld [vmem:[%s2413_s2 + $0x70] ss:$8 sps:$4 sm:$0xff]   ;;  %v1674_v32 = vld [vmem:[%s2413_s2 + $0x84] ss:$8 sps:$4 sm:$0xff]  }
  0x10   : > { %1115 = vmatpush1.bf16.msra.mxu0 %v1643_v11  ;;  %1055 = vmatprep.subr.bf16.mxu1 %v1644_v12  ;;  %v1673_v31 = vld [vmem:[%s2413_s2 + $0x170] ss:$8 sps:$4 sm:$0xff]   ;;  %v1676_v33 = vld [vmem:[%s2413_s2 + $0x184] ss:$8 sps:$4 sm:$0xff]   ;;  %v1678_v34 = vld [vmem:[%s2413_s2 + $0x80] ss:$8 sps:$4 sm:$0xff]  }
  0x11   : > { %1116 = vmatprep.subr.bf16.mxu0 %v1646_v13  ;;  %v1679_v35 = vld [vmem:[%s2413_s2 + $0x180] ss:$8 sps:$4 sm:$0xff]   ;;  %s2421_s16 = smov (!%p203_p3, %s1336_s16), 1  ;;  %v1680_v36 = vld [vmem:[%s2413_s2 + $0x94] ss:$8 sps:$4 sm:$0xff]   ;;  %v1997_v2 = vshrl.u32 %v377_v46, 7 }
  0x12   : > { %v1682_v37 = vld [vmem:[%s2413_s2 + $0x194] ss:$8 sps:$4 sm:$0xff]   ;;  %v1684_v38 = vld [vmem:[%s2413_s2 + $0x90] ss:$8 sps:$4 sm:$0xff]   ;;  %s1617_s23 = smul.u32 40, %s2421_s16 }
  0x13   : > { %1056 = vmatpush1.bf16.msra.mxu1 %v1648_v14  ;;  %v1685_v39 = vld [vmem:[%s2413_s2 + $0x190] ss:$8 sps:$4 sm:$0xff]   ;;  %v1686_v40 = vld [vmem:[%s2413_s2 + $0xa4] ss:$8 sps:$4 sm:$0xff]   ;;  %s1616_s30 = smul.u32 400, %s2421_s16  ;;  %vm389_vm0 = vcmp.lt.s32.totalorder %v1997_v2, 1 }
  0x14   : > { %1117 = vmatpush1.bf16.msra.mxu0 %v1649_v15  ;;  %1057 = vmatprep.subr.bf16.mxu1 %v1650_v16  ;;  %v1688_v41 = vld [vmem:[%s2413_s2 + $0x1a4] ss:$8 sps:$4 sm:$0xff]   ;;  %v1690_v42 = vld [vmem:[%s2413_s2 + $0xa0] ss:$8 sps:$4 sm:$0xff]   ;;  %s212_s11 = scalar_lea.vmem %s2412_s1, %s1617_s23  ;;  %v1692_v44 = vld [vmem:[%s2413_s2 + $0xb4] ss:$8 sps:$4 sm:$0xff]  }
  0x15   : > { %1118 = vmatprep.subr.bf16.mxu0 %v1652_v17  ;;  %v1691_v43 = vld [vmem:[%s2413_s2 + $0x1a0] ss:$8 sps:$4 sm:$0xff]   ;;  %v1694_v45 = vld [vmem:[%s2413_s2 + $0x1b4] ss:$8 sps:$4 sm:$0xff]   ;;  %s1965_s20 = scalar_lea.vmem %s2411_s0, %s1616_s30  ;;  %v1696_v47 = vld [vmem:[%s2413_s2 + $0xb0] ss:$8 sps:$4 sm:$0xff]  }
  0x16   : > { %v1697_v48 = vld [vmem:[%s2413_s2 + $0x1b0] ss:$8 sps:$4 sm:$0xff]   ;;  %v218_v49 = vld [vmem:[%s212_s11] sm:$0xff]  ;;  %v219_v52 = vld [vmem:[%s212_s11 + $0x8] sm:$0xff]  ;;  %vm1552_vm1 = vcmp.ne.s32.totalorder %v1997_v2, 0  ;;  %vm410_vm3 = vcmp.lt.s32.totalorder %v1997_v2, 7 }
  0x17   : > { %1058 = vmatpush1.bf16.msra.mxu1 %v1654_v18  ;;  %v1698_v50 = vld [vmem:[%s2413_s2 + $0xc4] ss:$8 sps:$4 sm:$0xff]   ;;  %v220_v53 = vld [vmem:[%s212_s11 + $0x10] sm:$0xff]  ;;  %v221_v54 = vld [vmem:[%s212_s11 + $0x18] sm:$0xff]  ;;  %v1979_v55 = vunpack.c.h.bf16 %v218_v49  ;;  %v1983_v57 = vunpack.c.h.bf16 %v219_v52  ;;  %v2005_v5 = vunpack.c.l.bf16 %v218_v49  ;;  %v2013_v12 = vunpack.c.l.bf16 %v219_v52 }
  0x18   : > { %1119 = vmatpush1.bf16.msra.mxu0 %v1655_v19  ;;  %1059 = vmatprep.subr.bf16.mxu1 %v1656_v20  ;;  %v1700_v51 = vld [vmem:[%s2413_s2 + $0x1c4] ss:$8 sps:$4 sm:$0xff]   ;;  %v1985_v58 = vunpack.c.h.bf16 %v220_v53  ;;  %v238_v60 = vld [vmem:[%s1965_s20 + $0x18] sm:$0xff]  ;;  %v1989_v61 = vunpack.c.h.bf16 %v221_v54  ;;  %v1702_v3 = vld [vmem:[%s2413_s2 + $0xc0] ss:$8 sps:$4 sm:$0xff]   ;;  %v2021_v19 = vunpack.c.l.bf16 %v220_v53  ;;  %vm1553_vm4 = vcmp.ne.s32.totalorder %v1997_v2, 7 }
  0x19   : > { %1120 = vmatprep.subr.bf16.mxu0 %v1658_v21  ;;  %v1981_v56 = vld [vmem:[%s212_s11 + $0x20] sm:$0xff]  ;;  %v234_v59 = vld [vmem:[%s1965_s20 + $0x8] sm:$0xff]  ;;  %v250_v0 = vld [vmem:[%s1965_s20 + $0x38] sm:$0xff]  ;;  %v240_v7 = vmul.f32 %v238_v60, %v1983_v57 }
  0x1a   : > { %v1992_v62 = vunpack.c.h.bf16 %v1981_v56  ;;  %v244_v63 = vld [vmem:[%s1965_s20 + $0x28] sm:$0xff]  ;;  %v236_v6 = vmul.f32 %v234_v59, %v1979_v55  ;;  %v1345_v9 = vld [vmem:[%s1965_s20 + $0x58] sm:$0xff]  ;;  %v252_v13 = vmul.f32 %v250_v0, %v1989_v61  ;;  %v2060_v49 = vunpack.c.l.bf16 %v1981_v56  ;;  %v1346_v53 = vld [vmem:[%s1965_s20 + $0x60] sm:$0xff] }
  0x1b   : > { %1060 = vmatpush1.bf16.msra.mxu1 %v1660_v22  ;;  %v256_v1 = vld [vmem:[%s1965_s20 + $0x48] sm:$0xff]  ;;  %v246_v8 = vmul.f32 %v244_v63, %v1985_v58  ;;  %v1349_v11 = vld [vmem:[%s1965_s20 + $0x78] sm:$0xff]  ;;  %v265_v14 = vmul.f32 %v1345_v9, %v1979_v55  ;;  %v255_v0 = vld [vmem:[%s1965_s20 + $0x40] sm:$0xff] }
  0x1c   : > { %1121 = vmatpush1.bf16.msra.mxu0 %v1661_v23  ;;  %1061 = vmatprep.subr.bf16.mxu1 %v1662_v24  ;;  %v1703_v4 = vld [vmem:[%s2413_s2 + $0x1c0] ss:$8 sps:$4 sm:$0xff]   ;;  %v1353_v17 = vld [vmem:[%s1965_s20 + $0x98] sm:$0xff]  ;;  %v242_v20 = vadd.f32 %v240_v7, %v236_v6  ;;  %v258_v21 = vmul.f32 %v256_v1, %v1992_v62  ;;  %v275_v22 = vmul.f32 %v1349_v11, %v1985_v58  ;;  %v1712_v59 = vld [vmem:[%s2413_s2 + $0x1e4] ss:$8 sps:$4 sm:$0xff]  }
  0x1d   : > { %1122 = vmatprep.subr.bf16.mxu0 %v1664_v25  ;;  %v1347_v10 = vld [vmem:[%s1965_s20 + $0x68] sm:$0xff]  ;;  %v1377_v23 = vld [vmem:[%s1965_s20 + $0x158] sm:$0xff]  ;;  %v1350_v1 = vld [vmem:[%s1965_s20 + $0x80] sm:$0xff] }
  0x1e   : > { %v269_v15 = vmul.f32 %v1347_v10, %v1983_v57  ;;  %v1351_v16 = vld [vmem:[%s1965_s20 + $0x88] sm:$0xff]  ;;  %v1381_v25 = vld [vmem:[%s1965_s20 + $0x178] sm:$0xff]  ;;  %v1352_v10 = vld [vmem:[%s1965_s20 + $0x90] sm:$0xff] }
  0x1f   : > { %1062 = vmatpush1.bf16.msra.mxu1 %v1666_v26  ;;  %v1375_v18 = vld [vmem:[%s1965_s20 + $0x148] sm:$0xff]  ;;  %v1704_v26 = vld [vmem:[%s2413_s2 + $0xd4] ss:$8 sps:$4 sm:$0xff]   ;;  %v1374_v11 = vld [vmem:[%s1965_s20 + $0x140] sm:$0xff] }
  0x20   : > { %1123 = vmatpush1.bf16.msra.mxu0 %v1667_v27  ;;  %1063 = vmatprep.subr.bf16.mxu1 %v1668_v28  ;;  %v1379_v24 = vld [vmem:[%s1965_s20 + $0x168] sm:$0xff]  ;;  %v1706_v27 = vld [vmem:[%s2413_s2 + $0x1d4] ss:$8 sps:$4 sm:$0xff]   ;;  %v2034_v28 = vunpack.c.l.bf16 %v221_v54  ;;  %vm2135_vm2 = vmpackc.low %vm1552_vm1, %vm1552_vm1 }
  0x21   : > { %1124 = vmatprep.subr.bf16.mxu0 %v1670_v29  ;;  %v271_v29 = vadd.f32 %v269_v15, %v265_v14  ;;  %v1348_v54 = vld [vmem:[%s1965_s20 + $0x70] sm:$0xff]  ;;  %vm2314_vm5 = vmpackc.low %vm1553_vm4, %vm1553_vm4 }
  0x23   : > { %1064 = vmatpush1.bf16.msra.mxu1 %v1672_v30  ;;  %v281_v30 = vmul.f32 %v1351_v16, %v1989_v61  ;;  %v268_v16 = vmul.f32 %v1346_v53, %v2013_v12 }
  0x24   : > { %1125 = vmatpush1.bf16.msra.mxu0 %v1673_v31  ;;  %1065 = vmatprep.subr.bf16.mxu1 %v1674_v32  ;;  %v352_v31 = vmul.f32 %v1375_v18, %v1979_v55  ;;  %v233_v32 = vld [vmem:[%s1965_s20] sm:$0xff]  ;;  %v1376_v18 = vld [vmem:[%s1965_s20 + $0x150] sm:$0xff] }
  0x25   : > { %1126 = vmatprep.subr.bf16.mxu0 %v1676_v33  ;;  %v1708_v33 = vld [vmem:[%s2413_s2 + $0xd0] ss:$8 sps:$4 sm:$0xff]  }
  0x27   : > { %1066 = vmatpush1.bf16.msra.mxu1 %v1678_v34  ;;  %v248_v34 = vadd.f32 %v246_v8, %v242_v20  ;;  %v1378_v20 = vld [vmem:[%s1965_s20 + $0x160] sm:$0xff] }
  0x28   : > { %1127 = vmatpush1.bf16.msra.mxu0 %v1679_v35  ;;  %1067 = vmatprep.subr.bf16.mxu1 %v1680_v36  ;;  %v287_v35 = vmul.f32 %v1353_v17, %v1992_v62  ;;  %v356_v36 = vmul.f32 %v1377_v23, %v1983_v57  ;;  %v274_v17 = vmul.f32 %v1348_v54, %v2021_v19 }
  0x29   : > { %1128 = vmatprep.subr.bf16.mxu0 %v1682_v37  ;;  %v362_v37 = vmul.f32 %v1379_v24, %v1985_v58  ;;  %v257_v23 = vmul.f32 %v255_v0, %v2060_v49  ;;  %v280_v24 = vmul.f32 %v1350_v1, %v2034_v28  ;;  %v1727_v1 = vld [vmem:[%s2413_s2 + $0x214] ss:$8 sps:$4 sm:$0xff]  }
  0x2b   : > { %1068 = vmatpush1.bf16.msra.mxu1 %v1684_v38  ;;  %v237_v38 = vld [vmem:[%s1965_s20 + $0x10] sm:$0xff] }
  0x2c   : > { %1129 = vmatpush1.bf16.msra.mxu0 %v1685_v39  ;;  %1069 = vmatprep.subr.bf16.mxu1 %v1686_v40  ;;  %v243_v39 = vld [vmem:[%s1965_s20 + $0x20] sm:$0xff]  ;;  %v249_v40 = vld [vmem:[%s1965_s20 + $0x30] sm:$0xff]  ;;  %v239_v46 = vmul.f32 %v237_v38, %v2013_v12  ;;  %v286_v38 = vmul.f32 %v1352_v10, %v2060_v49  ;;  %v1355_v10 = vld [vmem:[%s1965_s20 + $0xa8] sm:$0xff] }
  0x2d   : > { %1130 = vmatprep.subr.bf16.mxu0 %v1688_v41  ;;  %v1709_v41 = vld [vmem:[%s2413_s2 + $0x1d0] ss:$8 sps:$4 sm:$0xff]   ;;  %v245_v52 = vmul.f32 %v243_v39, %v2021_v19  ;;  %v251_v56 = vmul.f32 %v249_v40, %v2034_v28  ;;  %v1382_v40 = vld [vmem:[%s1965_s20 + $0x180] sm:$0xff] }
  0x2f   : > { %1070 = vmatpush1.bf16.msra.mxu1 %v1690_v42  ;;  %v277_v42 = vadd.f32 %v275_v22, %v271_v29 }
  0x30   : > { %1131 = vmatpush1.bf16.msra.mxu0 %v1691_v43  ;;  %1071 = vmatprep.subr.bf16.mxu1 %v1692_v44  ;;  %v368_v43 = vmul.f32 %v1381_v25, %v1989_v61  ;;  %v1383_v44 = vld [vmem:[%s1965_s20 + $0x188] sm:$0xff]  ;;  %v1380_v25 = vld [vmem:[%s1965_s20 + $0x170] sm:$0xff] }
  0x31   : > { %1132 = vmatprep.subr.bf16.mxu0 %v1694_v45  ;;  %v235_v45 = vmul.f32 %v233_v32, %v2005_v5  ;;  %v283_v60 = vadd.f32 %v281_v30, %v277_v42  ;;  %v374_v8 = vmul.f32 %v1383_v44, %v1992_v62  ;;  %v367_v39 = vmul.f32 %v1380_v25, %v2034_v28  ;;  %v1367_v25 = vld [vmem:[%s1965_s20 + $0x108] sm:$0xff] }
  0x33   : > { %1072 = vmatpush1.bf16.msra.mxu1 %v1696_v47  ;;  %v1344_v47 = vld [vmem:[%s1965_s20 + $0x50] sm:$0xff]  ;;  %v241_v63 = vadd.f32 %v239_v46, %v235_v45  ;;  %v2087_v14 = vadd.f32 %v287_v35, %v283_v60 }
  0x34   : > { %1133 = vmatpush1.bf16.msra.mxu0 %v1697_v48  ;;  %1073 = vmatprep.subr.bf16.mxu1 %v1698_v50  ;;  %v1710_v48 = vld [vmem:[%s2413_s2 + $0xe4] ss:$8 sps:$4 sm:$0xff]   ;;  %v254_v50 = vadd.f32 %v252_v13, %v248_v34  ;;  %v264_v9 = vmul.f32 %v1344_v47, %v2005_v5  ;;  %v1716_v13 = vld [vmem:[%s2413_s2 + $0xf4] ss:$8 sps:$4 sm:$0xff]   ;;  %v361_v34 = vmul.f32 %v1378_v20, %v2021_v19  ;;  %v1720_v35 = vld [vmem:[%s2413_s2 + $0xf0] ss:$8 sps:$4 sm:$0xff]  }
  0x35   : > { %1134 = vmatprep.subr.bf16.mxu0 %v1700_v51  ;;  %v358_v51 = vadd.f32 %v356_v36, %v352_v31  ;;  %v247_v15 = vadd.f32 %v245_v52, %v241_v63  ;;  %v351_v31 = vmul.f32 %v1374_v11, %v2005_v5  ;;  %v1724_v47 = vld [vmem:[%s2413_s2 + $0x204] ss:$8 sps:$4 sm:$0xff]   ;;  %v373_v52 = vmul.f32 %v1382_v40, %v2060_v49  ;;  %v1722_v63 = vld [vmem:[%s2413_s2 + $0x200] ss:$8 sps:$4 sm:$0xff]   ;;  %v1357_v11 = vld [vmem:[%s1965_s20 + $0xb8] sm:$0xff] }
  0x36   : > { %v2078_v6 = vadd.f32 %v258_v21, %v254_v50  ;;  %v270_v30 = vadd.f32 %v268_v16, %v264_v9  ;;  %v1730_v9 = vld [vmem:[%s2413_s2 + $0x224] ss:$8 sps:$4 sm:$0xff]   ;;  %v298_v16 = vmul.f32 %v1357_v11, %v1983_v57  ;;  %v1757_v50 = vld [vmem:[%s2413_s2 + $0x2b4] ss:$8 sps:$4 sm:$0xff]  }
  0x37   : > { %1074 = vmatpush1.bf16.msra.mxu1 %v1702_v3  ;;  %v1714_v3 = vld [vmem:[%s2413_s2 + $0xe0] ss:$8 sps:$4 sm:$0xff]   ;;  %v364_v7 = vadd.f32 %v362_v37, %v358_v51  ;;  %v253_v29 = vadd.f32 %v251_v56, %v247_v15  ;;  %v294_v15 = vmul.f32 %v1355_v10, %v1979_v55 }
  0x38   : > { %1135 = vmatpush1.bf16.msra.mxu0 %v1703_v4  ;;  %1075 = vmatprep.subr.bf16.mxu1 %v1704_v26  ;;  %v1715_v4 = vld [vmem:[%s2413_s2 + $0x1e0] ss:$8 sps:$4 sm:$0xff]   ;;  %v380_v22 = vrot.slane %v2078_v6, 7  ;;  %v1718_v26 = vld [vmem:[%s2413_s2 + $0x1f4] ss:$8 sps:$4 sm:$0xff]   ;;  %v276_v37 = vadd.f32 %v274_v17, %v270_v30  ;;  %v450_v45 = vpack.c.bf16 %v2087_v14, %v2078_v6 }
  0x39   : > { %1136 = vmatprep.subr.bf16.mxu0 %v1706_v27  ;;  %v370_v21 = vadd.f32 %v368_v43, %v364_v7  ;;  %v382_v27 = vrot.slane %v2087_v14, 7  ;;  %v2121_v43 = vadd.f32 %v257_v23, %v253_v29  ;;  %v1359_v17 = vld [vmem:[%s1965_s20 + $0xc8] sm:$0xff]  ;;  %v300_v30 = vadd.f32 %v298_v16, %v294_v15  ;;  %v1354_v40 = vld [vmem:[%s1965_s20 + $0xa0] sm:$0xff] }
  0x3a   : > { %v282_v46 = vadd.f32 %v280_v24, %v276_v37  ;;  %1142 = vmatprep.mubr.bf16.mxu0 %v450_v45  ;;  %v1363_v20 = vld [vmem:[%s1965_s20 + $0xe8] sm:$0xff]  ;;  %v1365_v24 = vld [vmem:[%s1965_s20 + $0xf8] sm:$0xff]  ;;  %v293_v45 = vmul.f32 %v1354_v40, %v2005_v5 }
  0x3b   : > { %1076 = vmatpush1.bf16.msra.mxu1 %v1708_v33  ;;  %v2102_v32 = vadd.f32 %v374_v8, %v370_v21  ;;  %v355_v33 = vmul.f32 %v1376_v18, %v2013_v12  ;;  %v397_v36 = vsel %vm389_vm0, %v380_v22, %v382_v27  ;;  %v379_v60 = vrot.slane %v2121_v43, 7  ;;  %v1725_v8 = vld [vmem:[%s2413_s2 + $0x210] ss:$8 sps:$4 sm:$0xff]   ;;  %v1728_v29 = vld [vmem:[%s2413_s2 + $0x220] ss:$8 sps:$4 sm:$0xff]  }
  0x3c   : > { %1137 = vmatpush1.bf16.msra.mxu0 %v1709_v41  ;;  %1077 = vmatprep.subr.bf16.mxu1 %v1710_v48  ;;  %v1721_v41 = vld [vmem:[%s2413_s2 + $0x1f0] ss:$8 sps:$4 sm:$0xff]   ;;  %v2140_v54 = vadd.f32 %v286_v38, %v282_v46  ;;  %v1745_v40 = vld [vmem:[%s2413_s2 + $0x274] ss:$8 sps:$4 sm:$0xff]  }
  0x3d   : > { %1138 = vmatprep.subr.bf16.mxu0 %v1712_v59  ;;  %v388_v42 = vrot.slane %v2102_v32, 7  ;;  %v357_v44 = vadd.f32 %v355_v33, %v351_v31  ;;  %v1361_v18 = vld [vmem:[%s1965_s20 + $0xd8] sm:$0xff]  ;;  %v323_v31 = vmul.f32 %v1365_v24, %v1979_v55  ;;  %v327_v33 = vmul.f32 %v1367_v25, %v1983_v57 }
  0x3e   : > { %v381_v56 = vrot.slane %v2140_v54, 7  ;;  %v449_v0 = vpack.c.bf16 %v2140_v54, %v2121_v43  ;;  %v310_v23 = vmul.f32 %v1361_v18, %v1989_v61  ;;  %v1373_v37 = vld [vmem:[%s1965_s20 + $0x138] sm:$0xff] }
  0x3f   : > { %1078 = vmatpush1.bf16.msra.mxu1 %v1714_v3  ;;  %v399_v48 = vsel %vm389_vm0, %v388_v42, %v380_v22  ;;  %v363_v51 = vadd.f32 %v361_v34, %v357_v44  ;;  %v304_v22 = vmul.f32 %v1359_v17, %v1985_v58  ;;  %v1731_v55 = vld [vmem:[%s2413_s2 + $0x230] ss:$8 sps:$4 sm:$0xff]   ;;  %v329_v38 = vadd.f32 %v327_v33, %v323_v31  ;;  %v1358_v44 = vld [vmem:[%s1965_s20 + $0xc0] sm:$0xff] }
  0x40   : > { %1139 = vmatpush1.bf16.msra.mxu0 %v1715_v4  ;;  %1079 = vmatprep.subr.bf16.mxu1 %v1716_v13  ;;  %v1483_v53 = vpack.c.bf16 %v397_v36, %v399_v48  ;;  %v396_v7 = vsel %vm389_vm0, %v379_v60, %v381_v56  ;;  %v1733_v36 = vld [vmem:[%s2413_s2 + $0x234] ss:$8 sps:$4 sm:$0xff]  }
  0x41   : > { %1140 = vmatprep.subr.bf16.mxu0 %v1718_v26  ;;  %v369_v59 = vadd.f32 %v367_v39, %v363_v51  ;;  %v1369_v26 = vld [vmem:[%s1965_s20 + $0x118] sm:$0xff]  ;;  %v306_v57 = vadd.f32 %v304_v22, %v300_v30  ;;  %v1360_v48 = vld [vmem:[%s1965_s20 + $0xd0] sm:$0xff]  ;;  %v1362_v51 = vld [vmem:[%s1965_s20 + $0xe0] sm:$0xff] }
  0x42   : > { %1484 = vmatprep.mubr.msk.bf16.mxu1 %vm2135_vm2, %v1483_v53  ;;  %v333_v34 = vmul.f32 %v1369_v26, %v1985_v58  ;;  %v316_v58 = vmul.f32 %v1363_v20, %v1992_v62  ;;  %v1372_v17 = vld [vmem:[%s1965_s20 + $0x130] sm:$0xff]  ;;  %v315_v20 = vmul.f32 %v1362_v51, %v2060_v49 }
  0x43   : > { %1080 = vmatpush1.bf16.msra.mxu1 %v1720_v35  ;;  %v2154_v3 = vadd.f32 %v373_v52, %v369_v59  ;;  %v1371_v35 = vld [vmem:[%s1965_s20 + $0x128] sm:$0xff]  ;;  %v1364_v52 = vld [vmem:[%s1965_s20 + $0xf0] sm:$0xff]  ;;  %v312_v53 = vadd.f32 %v310_v23, %v306_v57  ;;  %v345_v59 = vmul.f32 %v1373_v37, %v1992_v62  ;;  %v344_v24 = vmul.f32 %v1372_v17, %v2060_v49 }
  0x44   : > { %1141 = vmatpush1.bf16.msra.mxu0 %v1721_v41  ;;  %1554 = vmatprep.subr.bf16.mxu1 %v1724_v47  ;;  %v339_v39 = vmul.f32 %v1371_v35, %v1989_v61  ;;  %v1356_v41 = vld [vmem:[%s1965_s20 + $0xb0] sm:$0xff]  ;;  %v335_v61 = vadd.f32 %v333_v34, %v329_v38  ;;  %v322_v11 = vmul.f32 %v1364_v52, %v2005_v5  ;;  %v1734_v5 = vld [vmem:[%s2413_s2 + $0x240] ss:$8 sps:$4 sm:$0xff]   ;;  %v401_v57 = vrot.slane %v2078_v6, 1  ;;  %v1748_v52 = vld [vmem:[%s2413_s2 + $0x284] ss:$8 sps:$4 sm:$0xff]  }
  0x45   : > { %1171 = vmatprep.subr.bf16.mxu0 %v1724_v47  ;;  %v387_v4 = vrot.slane %v2154_v3, 7  ;;  %v297_v46 = vmul.f32 %v1356_v41, %v2013_v12  ;;  %v303_v47 = vmul.f32 %v1358_v44, %v2021_v19  ;;  %v2221_v16 = vadd.f32 %v316_v58, %v312_v53  ;;  %v1737_v49 = vld [vmem:[%s2413_s2 + $0x250] ss:$8 sps:$4 sm:$0xff]   ;;  %v1758_v17 = vld [vmem:[%s2413_s2 + $0x2c0] ss:$8 sps:$4 sm:$0xff]  }
  0x46   : > { %v341_v62 = vadd.f32 %v339_v39, %v335_v61  ;;  %v454_v37 = vpack.c.bf16 %v2102_v32, %v2102_v32  ;;  %v403_v58 = vrot.slane %v2087_v14, 1  ;;  %v1740_v14 = vld [vmem:[%s2413_s2 + $0x260] ss:$8 sps:$4 sm:$0xff]   ;;  %v1743_v51 = vld [vmem:[%s2413_s2 + $0x270] ss:$8 sps:$4 sm:$0xff]   ;;  %v453_v61 = vpack.c.bf16 %v2154_v3, %v2154_v3 }
  0x47   : > { %1143 = vmatmul.mubr.bf16.vlgmr.msra.gmra.mrb[0].mxu0 %v449_v0  ;;  %v398_v13 = vsel %vm389_vm0, %v387_v4, %v379_v60  ;;  %v309_v60 = vmul.f32 %v1360_v48, %v2034_v28  ;;  %v1368_v0 = vld [vmem:[%s1965_s20 + $0x110] sm:$0xff]  ;;  %v299_v10 = vadd.f32 %v297_v46, %v293_v45  ;;  %v405_v39 = vrot.slane %v2221_v16, 1 }
  0x48   : > { %1172 = vmatpush1.bf16.msra.mxu0 %v1722_v63  ;;  %v1488_v21 = vpack.c.bf16 %v396_v7, %v398_v13  ;;  %v1736_v7 = vld [vmem:[%s2413_s2 + $0x244] ss:$8 sps:$4 sm:$0xff]   ;;  %v332_v15 = vmul.f32 %v1368_v0, %v2021_v19  ;;  %v384_v19 = vrot.slane %v2221_v16, 7  ;;  %v409_v46 = vrot.slane %v2102_v32, 1 }
  0x49   : > { %1173 = vmatprep.subr.bf16.mxu0 %v1727_v1  ;;  %v305_v18 = vadd.f32 %v303_v47, %v299_v10  ;;  %v416_v47 = vsel %vm410_vm3, %v403_v58, %v405_v39  ;;  %v418_v48 = vsel %vm410_vm3, %v401_v57, %v403_v58 }
  0x4a   : > { %1489 = vmatmul.mubr.msk.bf16.vlgmr.msra.gmra.mrb[0].mxu1 %vm2135_vm2, %v1488_v21  ;;  %v395_v25 = vsel %vm389_vm0, %v382_v27, %v384_v19  ;;  %v1742_v27 = vld [vmem:[%s2413_s2 + $0x264] ss:$8 sps:$4 sm:$0xff]  }
  0x4b   : > { %1570 = vmatpush1.bf16.msra.mxu1 %v1722_v63  ;;  %v1366_v63 = vld [vmem:[%s1965_s20 + $0x100] sm:$0xff] }
  0x4c   : > { %1174 = vmatpush1.bf16.msra.mxu0 %v1725_v8  ;;  %1555 = vmatprep.subr.bf16.mxu1 %v1727_v1  ;;  %v1370_v1 = vld [vmem:[%s1965_s20 + $0x120] sm:$0xff]  ;;  %v326_v13 = vmul.f32 %v1366_v63, %v2013_v12  ;;  %v2229_v12 = vadd.f32 %v345_v59, %v341_v62  ;;  %v1513_v59 = vpack.c.bf16 %v416_v47, %v418_v48  ;;  %s217_s20 = scalar_lea.vmem %s2415_s4, %s1617_s23 }
  0x4d   : > { %1175 = vmatprep.subr.bf16.mxu0 %v1730_v9  ;;  %v338_v22 = vmul.f32 %v1370_v1, %v2034_v28  ;;  %v1760_v62 = vld [vmem:[%s2413_s2 + $0x2c4] ss:$8 sps:$4 sm:$0xff]  }
  0x4e   : > { %v328_v21 = vadd.f32 %v326_v13, %v322_v11  ;;  %v386_v28 = vrot.slane %v2229_v12, 7  ;;  %v452_v26 = vpack.c.bf16 %v2229_v12, %v2221_v16  ;;  %v407_v45 = vrot.slane %v2229_v12, 1  ;;  %v1749_v11 = vld [vmem:[%s2413_s2 + $0x290] ss:$8 sps:$4 sm:$0xff]   ;;  %v1754_v13 = vld [vmem:[%s2413_s2 + $0x2a4] ss:$8 sps:$4 sm:$0xff]  }
  0x4f   : > { %1571 = vmatpush1.bf16.msra.mxu1 %v1725_v8  ;;  %v1739_v8 = vld [vmem:[%s2413_s2 + $0x254] ss:$8 sps:$4 sm:$0xff]   ;;  %v1755_v16 = vld [vmem:[%s2413_s2 + $0x2b0] ss:$8 sps:$4 sm:$0xff]  }
  0x50   : > { %1176 = vmatpush1.bf16.msra.mxu0 %v1728_v29  ;;  %1556 = vmatprep.subr.bf16.mxu1 %v1730_v9  ;;  %v311_v9 = vadd.f32 %v309_v60, %v305_v18  ;;  %v334_v23 = vadd.f32 %v332_v15, %v328_v21  ;;  %v412_v60 = vsel %vm410_vm3, %v407_v45, %v409_v46  ;;  %v1752_v15 = vld [vmem:[%s2413_s2 + $0x2a0] ss:$8 sps:$4 sm:$0xff]   ;;  %v1763_v18 = vld [vmem:[%s2413_s2 + $0x2d4] ss:$8 sps:$4 sm:$0xff]   ;;  %v1766_v21 = vld [vmem:[%s2413_s2 + $0x2e4] ss:$8 sps:$4 sm:$0xff]  }
  0x51   : > { %1177 = vmatprep.subr.bf16.mxu0 %v1733_v36  ;;  %1152 = vmatprep.mubr.bf16.mxu0 %v452_v26  ;;  %v414_v63 = vsel %vm410_vm3, %v405_v39, %v407_v45 }
  0x52   : > { %v2243_v30 = vadd.f32 %v315_v20, %v311_v9  ;;  %v340_v31 = vadd.f32 %v338_v22, %v334_v23  ;;  %v1523_v10 = vpack.c.bf16 %v412_v60, %v414_v63  ;;  %v1761_v20 = vld [vmem:[%s2413_s2 + $0x2d0] ss:$8 sps:$4 sm:$0xff]   ;;  %v400_v22 = vrot.slane %v2121_v43, 1 }
  0x53   : > { %1572 = vmatpush1.bf16.msra.mxu1 %v1728_v29  ;;  %v393_v29 = vsel %vm389_vm0, %v384_v19, %v386_v28  ;;  %v1764_v19 = vld [vmem:[%s2413_s2 + $0x2e0] ss:$8 sps:$4 sm:$0xff]   ;;  %v1767_v43 = vld [vmem:[%s2413_s2 + $0x2f0] ss:$8 sps:$4 sm:$0xff]   ;;  %v408_v23 = vrot.slane %v2154_v3, 1  ;;  %v420_v3 = vsel %vm410_vm3, %v409_v46, %v401_v57 }
  0x54   : > { %1178 = vmatpush1.bf16.msra.mxu0 %v1731_v55  ;;  %1557 = vmatprep.subr.bf16.mxu1 %v1733_v36  ;;  %v1493_v33 = vpack.c.bf16 %v393_v29, %v395_v25  ;;  %v2253_v34 = vadd.f32 %v344_v24, %v340_v31  ;;  %v383_v35 = vrot.slane %v2243_v30, 7  ;;  %v391_v36 = vsel %vm389_vm0, %v386_v28, %v388_v42 }
  0x55   : > { %1179 = vmatprep.subr.bf16.mxu0 %v1736_v7  ;;  %v1503_v41 = vpack.c.bf16 %v391_v36, %v391_v36  ;;  %v404_v12 = vrot.slane %v2243_v30, 1  ;;  %v1533_v31 = vpack.c.bf16 %v420_v3, %v420_v3  ;;  %v565_v36 = vsub.s32 1, %v1997_v2 }
  0x56   : > { %1494 = vmatprep.mubr.msk.bf16.mxu1 %vm2135_vm2, %v1493_v33  ;;  %v385_v38 = vrot.slane %v2253_v34, 7  ;;  %v451_v42 = vpack.c.bf16 %v2253_v34, %v2243_v30  ;;  %v406_v24 = vrot.slane %v2253_v34, 1  ;;  %v561_v34 = vsub.s32 0, %v1997_v2 }
  0x57   : > { %1573 = vmatpush1.bf16.msra.mxu1 %v1731_v55  ;;  %v394_v55 = vsel %vm389_vm0, %v381_v56, %v383_v35 }
  0x58   : > { %1180 = vmatpush1.bf16.msra.mxu0 %v1734_v5  ;;  %1558 = vmatprep.subr.bf16.mxu1 %v1736_v7  ;;  %v392_v56 = vsel %vm389_vm0, %v383_v35, %v385_v38  ;;  %v390_v53 = vsel %vm389_vm0, %v385_v38, %v387_v4  ;;  %v1746_v4 = vld [vmem:[%s2413_s2 + $0x280] ss:$8 sps:$4 sm:$0xff]   ;;  %v1751_v7 = vld [vmem:[%s2413_s2 + $0x294] ss:$8 sps:$4 sm:$0xff]   ;;  %v411_v25 = vsel %vm410_vm3, %v406_v24, %v408_v23 }
  0x59   : > { %1181 = vmatprep.subr.bf16.mxu0 %v1739_v8  ;;  %1153 = vmatmul.mubr.bf16.gmra.mrb[4].mxu0 %v451_v42  ;;  %v1498_v44 = vpack.c.bf16 %v392_v56, %v394_v55  ;;  %v1508_v1 = vpack.c.bf16 %v390_v53, %v390_v53  ;;  %v413_v26 = vsel %vm410_vm3, %v404_v12, %v406_v24  ;;  %v557_v35 = vld [vmem:[%s2414_s3] sm:$0x3] }
  0x5a   : > { %1162 = vmatprep.mubr.bf16.mxu0 %v454_v37  ;;  %v1528_v30 = vpack.c.bf16 %v411_v25, %v413_v26  ;;  %v562_v58 = vrot.slane %v557_v35, %v561_v34  ;;  %v566_v55 = vrot.slane %v557_v35, %v565_v36 }
  0x5b   : > { %1574 = vmatpush1.bf16.msra.mxu1 %v1734_v5  ;;  %v402_v5 = vrot.slane %v2140_v54, 1 }
  0x5c   : > { %1182 = vmatpush1.bf16.msra.mxu0 %v1737_v49  ;;  %1559 = vmatprep.subr.bf16.mxu1 %v1739_v8  ;;  %v1769_v8 = vld [vmem:[%s2413_s2 + $0x2f4] ss:$8 sps:$4 sm:$0xff]  }
  0x5d   : > { %1183 = vmatprep.subr.bf16.mxu0 %v1742_v27  ;;  %1499 = vmatmul.mubr.msk.bf16.gmra.mrb[4].mxu1 %vm2135_vm2, %v1498_v44  ;;  %v415_v54 = vsel %vm410_vm3, %v402_v5, %v404_v12  ;;  %v417_v9 = vsel %vm410_vm3, %v400_v22, %v402_v5 }
  0x5e   : > { %1504 = vmatprep.mubr.msk.bf16.mxu1 %vm2135_vm2, %v1503_v41  ;;  %v1518_v28 = vpack.c.bf16 %v415_v54, %v417_v9 }
  0x5f   : > { %1575 = vmatpush1.bf16.msra.mxu1 %v1737_v49  ;;  %v419_v49 = vsel %vm410_vm3, %v408_v23, %v400_v22 }
  0x60   : > { %1184 = vmatpush1.bf16.msra.mxu0 %v1740_v14  ;;  %1560 = vmatprep.subr.bf16.mxu1 %v1742_v27  ;;  %v1538_v29 = vpack.c.bf16 %v419_v49, %v419_v49 }
  0x61   : > { %1185 = vmatprep.subr.bf16.mxu0 %v1745_v40  ;;  %1163 = vmatmul.mubr.bf16.gmra.mrb[8].mxu0 %v453_v61 }
  0x62   : > { %1514 = vmatprep.mubr.msk.bf16.mxu0 %vm2314_vm5, %v1513_v59 }
  0x63   : > { %1576 = vmatpush1.bf16.msra.mxu1 %v1740_v14 }
  0x64   : > { %1186 = vmatpush1.bf16.msra.mxu0 %v1743_v51  ;;  %1561 = vmatprep.subr.bf16.mxu1 %v1745_v40 }
  0x65   : > { %1187 = vmatprep.subr.bf16.mxu0 %v1748_v52  ;;  %1509 = vmatmul.mubr.msk.bf16.gmra.mrb[8].mxu1 %vm2135_vm2, %v1508_v1 }
  0x66   : > { %1524 = vmatprep.mubr.msk.bf16.mxu1 %vm2314_vm5, %v1523_v10 }
  0x67   : > { %1577 = vmatpush1.bf16.msra.mxu1 %v1743_v51 }
  0x68   : > { %1188 = vmatpush1.bf16.msra.mxu0 %v1746_v4  ;;  %1562 = vmatprep.subr.bf16.mxu1 %v1748_v52 }
  0x69   : > { %1189 = vmatprep.subr.bf16.mxu0 %v1751_v7 }
  0x6b   : > { %1578 = vmatpush1.bf16.msra.mxu1 %v1746_v4 }
  0x6c   : > { %1190 = vmatpush1.bf16.msra.mxu0 %v1749_v11  ;;  %1563 = vmatprep.subr.bf16.mxu1 %v1751_v7 }
  0x6d   : > { %1191 = vmatprep.subr.bf16.mxu0 %v1754_v13 }
  0x6f   : > { %1579 = vmatpush1.bf16.msra.mxu1 %v1749_v11 }
  0x70   : > { %1192 = vmatpush1.bf16.msra.mxu0 %v1752_v15  ;;  %1564 = vmatprep.subr.bf16.mxu1 %v1754_v13 }
  0x71   : > { %1193 = vmatprep.subr.bf16.mxu0 %v1757_v50 }
  0x73   : > { %1580 = vmatpush1.bf16.msra.mxu1 %v1752_v15 }
  0x74   : > { %1194 = vmatpush1.bf16.msra.mxu0 %v1755_v16  ;;  %1565 = vmatprep.subr.bf16.mxu1 %v1757_v50 }
  0x75   : > { %1195 = vmatprep.subr.bf16.mxu0 %v1760_v62 }
  0x77   : > { %1581 = vmatpush1.bf16.msra.mxu1 %v1755_v16 }
  0x78   : > { %1196 = vmatpush1.bf16.msra.mxu0 %v1758_v17  ;;  %1566 = vmatprep.subr.bf16.mxu1 %v1760_v62 }
  0x79   : > { %1197 = vmatprep.subr.bf16.mxu0 %v1763_v18 }
  0x7b   : > { %1582 = vmatpush1.bf16.msra.mxu1 %v1758_v17 }
  0x7c   : > { %1198 = vmatpush1.bf16.msra.mxu0 %v1761_v20  ;;  %1567 = vmatprep.subr.bf16.mxu1 %v1763_v18 }
  0x7d   : > { %1199 = vmatprep.subr.bf16.mxu0 %v1766_v21 }
  0x7f   : > { %1583 = vmatpush1.bf16.msra.mxu1 %v1761_v20 }
  0x80   : > { %1200 = vmatpush1.bf16.msra.mxu0 %v1764_v19  ;;  %1568 = vmatprep.subr.bf16.mxu1 %v1766_v21 }
  0x81   : > { %1201 = vmatprep.subr.bf16.mxu0 %v1769_v8 }
  0x83   : > { %1584 = vmatpush1.bf16.msra.mxu1 %v1764_v19 }
  0x84   : > { %1202 = vmatpush1.bf16.msra.mxu0 %v1767_v43  ;;  %1569 = vmatprep.subr.bf16.mxu1 %v1769_v8 }
  0x87   : > { %1519 = vmatmul.mubr.msk.bf16.vlgmr.msra.gmra.mrb[0].mxu0 %vm2314_vm5, %v1518_v28  ;;  %1585 = vmatpush1.bf16.msra.mxu1 %v1767_v43 }
  0x8a   : > { %1529 = vmatmul.mubr.msk.bf16.vlgmr.msra.gmra.mrb[12].mxu1 %vm2314_vm5, %v1528_v30 }
  0x8b   : > { %1534 = vmatprep.mubr.msk.bf16.mxu1 %vm2314_vm5, %v1533_v31 }
  0x92   : > { %1539 = vmatmul.mubr.msk.bf16.gmra.mrb[16].mxu1 %vm2314_vm5, %v1538_v29 }
 0x11d   : > { %v1083_v6 = vpop.f32.mrb[0].mxu1 }
 0x11e   : > { %v1085_v32 = vpop.f32.mrb[1].mxu1  ;;  %v1084_v13 = vadd.f32 %v1083_v6, %v562_v58 }
 0x11f   : > { %v1087_v27 = vpop.f32.mrb[2].mxu1  ;;  %v1086_v15 = vadd.f32 %v1085_v32, %v566_v55 }
 0x120   : > { %v1089_v33 = vpop.f32.mrb[3].mxu1  ;;  %v1088_v16 = vadd.f32 %v1087_v27, %v562_v58 }
 0x121   : > { %v1090_v18 = vadd.f32 %v1089_v33, %v566_v55 }
 0x12c   : > { %v1154_v37 = vpop.f32.mrb[4].mxu0 }
 0x12d   : > { %v1156_v57 = vpop.f32.mrb[5].mxu0 }
 0x12e   : > { %v1158_v38 = vpop.f32.mrb[6].mxu0 }
 0x12f   : > { %v1160_v39 = vpop.f32.mrb[7].mxu0 }
 0x130   : > { %v1093_v42 = vpop.f32.mrb[4].mxu1 }
 0x131   : > { %v1094_v14 = vadd.f32 %v1093_v42, %v562_v58  ;;  %v1095_v40 = vpop.f32.mrb[5].mxu1 }
 0x132   : > { %v1096_v56 = vadd.f32 %v1095_v40, %v566_v55  ;;  %v1097_v41 = vpop.f32.mrb[6].mxu1 }
 0x133   : > { %v1098_v44 = vadd.f32 %v1097_v41, %v562_v58  ;;  %v1155_v45 = vadd.f32 %v1154_v37, %v1094_v14  ;;  %v1099_v46 = vpop.f32.mrb[7].mxu1 }
 0x134   : > { %v1100_v47 = vadd.f32 %v1099_v46, %v566_v55  ;;  %v1157_v48 = vadd.f32 %v1156_v57, %v1096_v56  ;;  %v1164_v52 = vpop.f32.mrb[8].mxu0 }
 0x135   : > { %v1159_v51 = vadd.f32 %v1158_v38, %v1098_v44  ;;  %v1166_v2 = vpop.f32.mrb[9].mxu0 }
 0x136   : > { %v1161_v53 = vadd.f32 %v1160_v39, %v1100_v47  ;;  %v1168_v61 = vpop.f32.mrb[10].mxu0 }
 0x137   : > { %v1169_v60 = vpop.f32.mrb[11].mxu0 }
 0x138   : > { %v1103_v59 = vpop.f32.mrb[8].mxu1 }
 0x139   : > { %v1104_v63 = vadd.f32 %v1103_v59, %v562_v58  ;;  %v1105_v0 = vpop.f32.mrb[9].mxu1 }
 0x13a   : > { %v1106_v4 = vadd.f32 %v1105_v0, %v566_v55  ;;  %v1107_v1 = vpop.f32.mrb[10].mxu1 }
 0x13b   : > { %v1108_v7 = vpop.f32.mrb[11].mxu1  ;;  %v1165_v10 = vadd.f32 %v1164_v52, %v1104_v63 }
 0x13c   : > { %v1167_v11 = vadd.f32 %v1166_v2, %v1106_v4 }
 0x15a   : > { %v1205_v50 = vpop.f32.mrb[0].mxu0 }
 0x15b   : > { %v1587_v62 = vadd.f32 %v1205_v50, %v1084_v13  ;;  %v1207_v17 = vpop.f32.mrb[1].mxu0 }
 0x15c   : > { %v1589_v20 = vadd.f32 %v1207_v17, %v1086_v15  ;;  %v1209_v21 = vpop.f32.mrb[2].mxu0 }
 0x15d   : > { %v1591_v22 = vadd.f32 %v1209_v21, %v1088_v16  ;;  %v1211_v5 = vpop.f32.mrb[3].mxu0  ;;  %v1215_v8 = vpop.f32.mrb[12].mxu1 }
 0x15e   : > { %v1547_v12 = vpack.c.bf16 %v1589_v20, %v1587_v62  ;;  %v1593_v19 = vadd.f32 %v1211_v5, %v1090_v18  ;;  %v1216_v54 = vadd.f32 %v1215_v8, %v1155_v45  ;;  %v1217_v9 = vpop.f32.mrb[13].mxu1 }
 0x15f   : > { %v1218_v23 = vadd.f32 %v1217_v9, %v1157_v48  ;;  %v1219_v24 = vpop.f32.mrb[14].mxu1 }
 0x160   : > { %1264 = vst [vmem:[%s217_s20] sm:$0xff] %v1547_v12  ;;  %v1548_v43 = vpack.c.bf16 %v1593_v19, %v1591_v22  ;;  %v1220_v28 = vadd.f32 %v1219_v24, %v1159_v51  ;;  %v1221_v25 = vpop.f32.mrb[15].mxu1 }
 0x161   : > { %v1549_v26 = vpack.c.bf16 %v1218_v23, %v1216_v54  ;;  %v1222_v3 = vadd.f32 %v1221_v25, %v1161_v53 }
 0x162   : > { %1265 = vst [vmem:[%s217_s20 + $0x8] sm:$0xff] %v1548_v43 }
 0x163   : > { %1266 = vst [vmem:[%s217_s20 + $0x10] sm:$0xff] %v1549_v26  ;;  %v1550_v30 = vpack.c.bf16 %v1222_v3, %v1220_v28 }
 0x165   : > { %1267 = vst [vmem:[%s217_s20 + $0x18] sm:$0xff] %v1550_v30  ;;  %v1225_v31 = vpop.f32.mrb[16].mxu1 }
 0x166   : > { %v1226_v49 = vadd.f32 %v1225_v31, %v1165_v10  ;;  %v1227_v29 = vpop.f32.mrb[17].mxu1 }
 0x167   : > { %v1228_v6 = vadd.f32 %v1227_v29, %v1167_v11  ;;  %v1229_v32 = vpop.f32.mrb[18].mxu1 }
 0x168   : > { %v1230_v27 = vpop.f32.mrb[19].mxu1 }
 0x169   : > { %v1551_v33 = vpack.c.bf16 %v1228_v6, %v1226_v49 }
 0x16b   : > { %1268 = vst [vmem:[%s217_s20 + $0x20] sm:$0xff] %v1551_v33 }
 0x16c PF: > { %s14_s15 = sadd.s32 1, %s1776_s15  }
 0x16d   : > { %p11_p4 = scmp.ge.s32.totalorder %s14_s15, 4  }
 0x16f   :  { %13 = sbr.rel (!%p11_p4) target bundleno = 1 (0x1), region = 73 }

</bundles_post_ra>
